<compile_context>
chip_gen: v7x
topology: tpu7x:2x2x1
jax: 0.10.0
libtpu: 0.0.40
codegen_flags: <defaults>
</compile_context>

<pallas_src>
import jax
import jax.numpy as jnp
from jax.experimental import pallas as pl
from jax.experimental.pallas import tpu as pltpu

_TILE_BUDGET_BYTES = 4 << 20  # ~4 MiB per tile -> ~16 MiB resident with 2x in+out buffers


def _copy_kernel(x_ref, o_ref):
    # Lane-dense tile copy; the regrouping semantics live entirely in the
    # wrapper-side metadata reshapes and the BlockSpec indexing.
    o_ref[...] = x_ref[...]


def _pick_row_block(m: int, n: int, itemsize: int) -> int:
    """Rows per grid step (full-width rows). Returns 0 for the per-row path."""
    rows_fit = max(1, _TILE_BUDGET_BYTES // max(1, n * itemsize))
    if rows_fit >= m:
        return m  # whole slab in one step
    rblk = (rows_fit // 8) * 8
    while rblk >= 8 and m % rblk != 0:
        rblk -= 8
    return rblk if rblk >= 8 else 0


def _pick_col_block(n: int, itemsize: int) -> int:
    """Lane-aligned column chunk for huge rows. Returns 0 if not splittable."""
    if n % 128 != 0:
        return 0
    cols_fit = max(128, ((_TILE_BUDGET_BYTES // max(1, itemsize)) // 128) * 128)
    cblk = min(cols_fit, n)
    while cblk >= 128 and n % cblk != 0:
        cblk -= 128
    return cblk if cblk >= 128 else 0


def grouper(x: jax.Array, g: int) -> jax.Array:
    """Pallas implementation of Grouper.forward.

    If x has 4 dims (b, c, h, w), returns (b, g, c // g, h, w); otherwise
    returns x unchanged (mirrors the PyTorch `if x.dim() == 4` guard).
    """
    if x.ndim != 4:
        return x

    b, c, h, w = x.shape
    assert c % g == 0, "channel count must be divisible by g"
    cg = c // g

    # Zero-cost metadata reshape: rows are (batch, group) pairs, columns are
    # the contiguous cg*h*w payload of that group.
    m, n = b * g, cg * h * w
    xf = jnp.reshape(x, (m, n))
    itemsize = jnp.dtype(x.dtype).itemsize

    row_bytes = n * itemsize
    if row_bytes <= _TILE_BUDGET_BYTES:
        rblk = _pick_row_block(m, n, itemsize)
        if rblk:
            grid = (m // rblk,)
            in_spec = pl.BlockSpec((rblk, n), lambda i: (i, 0))
            out_spec = pl.BlockSpec((rblk, n), lambda i: (i, 0))
        else:
            # One (squeezed) row per step; still lane-dense (full n lanes).
            grid = (m,)
            in_spec = pl.BlockSpec((None, n), lambda i: (i, 0))
            out_spec = pl.BlockSpec((None, n), lambda i: (i, 0))
        semantics = ("parallel",)
    else:
        # A single row exceeds the budget: split columns into lane-aligned
        # chunks so tiles stay within VMEM even for very large spatial extents.
        cblk = _pick_col_block(n, itemsize)
        if cblk:
            grid = (m, n // cblk)
            in_spec = pl.BlockSpec((None, cblk), lambda i, j: (i, j))
            out_spec = pl.BlockSpec((None, cblk), lambda i, j: (i, j))
            semantics = ("parallel", "parallel")
        else:
            # Last resort: full row per step (rows not lane-splittable cleanly).
            grid = (m,)
            in_spec = pl.BlockSpec((None, n), lambda i: (i, 0))
            out_spec = pl.BlockSpec((None, n), lambda i: (i, 0))
            semantics = ("parallel",)

    out2d = pl.pallas_call(
        _copy_kernel,
        out_shape=jax.ShapeDtypeStruct((m, n), x.dtype),
        grid=grid,
        in_specs=[in_spec],
        out_specs=out_spec,
        compiler_params=pltpu.CompilerParams(
            # 'parallel' lets v7x split grid steps across its 2 TCs when
            # grid > 1 (no effect on v5e/v6e single-TC chips).
            dimension_semantics=semantics,
            # Large tiles: above v5e's 16 MiB scoped default, well under v7x's
            # 64 MiB physical VMEM (<= ~16 MiB resident with 2x buffers).
            vmem_limit_bytes=32 << 20,
        ),
    )(xf)

    # Final zero-cost metadata reshape to the module's output layout.
    return jnp.reshape(out2d, (b, g, cg, h, w))


if __name__ == "__main__":
    key = jax.random.PRNGKey(0)
    b, c, h, w = 2, 4, 16, 16
    g = 2

    x = jax.random.normal(key, (b, c, h, w), dtype=jnp.float32)

    out = grouper(x, g)
    out = jax.block_until_ready(out)

    # Verify against the plain-JAX reference (pure reshape semantics).
    ref = jnp.reshape(x, (b, g, c // g, h, w))
    assert out.shape == (b, g, c // g, h, w)
    assert jnp.array_equal(out, ref)

    # Non-4D passthrough path (mirrors the PyTorch dim guard).
    x3 = jax.random.normal(key, (3, 5, 7), dtype=jnp.float32)
    assert jnp.array_equal(grouper(x3, g), x3)

    print("KERNEL_OK")
</pallas_src>

<mosaic_0001>
module attributes {stable_mosaic.version = 11 : i64} {
  func.func @_copy_kernel(%arg0: i32, %arg1: memref<4x512xf32, #tpu.memory_space<vmem>>, %arg2: memref<4x512xf32, #tpu.memory_space<vmem>>) attributes {dimension_semantics = [#tpu.dimension_semantics<parallel>], iteration_bounds = array<i64: 1>, scalar_prefetch = 0 : i64, scratch_operands = 0 : i64, tpu.core_type = #tpu.core_type<tc>, window_params = [{transform_indices = @transform_0, window_bounds = array<i64: 4, 512>}, {transform_indices = @transform_1, window_bounds = array<i64: 4, 512>}]} {
    %c0 = arith.constant 0 : index
    %c0_0 = arith.constant 0 : index
    %0 = vector.load %arg1[%c0, %c0_0] : memref<4x512xf32, #tpu.memory_space<vmem>>, vector<4x512xf32>
    %c0_1 = arith.constant 0 : index
    %c0_2 = arith.constant 0 : index
    %1 = vector.load %arg2[%c0_1, %c0_2] : memref<4x512xf32, #tpu.memory_space<vmem>>, vector<4x512xf32>
    tpu.vector_store %arg2[%c0_1, %c0_2], %0 {strides = array<i32>} : memref<4x512xf32, #tpu.memory_space<vmem>>, vector<4x512xf32>,
    return
  }
  func.func @transform_0(%arg0: i32) -> (i32, i32) {
    %c0_i32 = arith.constant 0 : i32
    %c0_i32_0 = arith.constant 0 : i32
    return %arg0, %c0_i32 : i32, i32
  }
  func.func @transform_1(%arg0: i32) -> (i32, i32) {
    %c0_i32 = arith.constant 0 : i32
    %c0_i32_0 = arith.constant 0 : i32
    return %arg0, %c0_i32 : i32, i32
  }
}

</mosaic_0001>

<bundles_post_ra>
// kernel: tpu_custom_call.1
= control target key start
LH: loop header
LB: loop body
LE: loop exit
PB: predicated region body
PF: predicated region fallthrough
CT: control target
= control target key end

     0   :  { %6 = vsyncpa [#allocation3], 0  ;;  %s126_s0 = inlined_call_operand.hbm [shape: f32[4,512], index: 0, kind: input, shape index: {}]   ;;  %s127_s1 = inlined_call_operand.hbm [shape: f32[4,512], index: 1, kind: output, shape index: {}]  }
   0x1   :  { %7 = vsyncpa [#allocation4], 0  ;;  %s90_s6 = smov [#allocation2]   ;;  %s42_s10 = scalar_lea.hbm %s126_s0, 256 }
   0x2   :  { %s14_s7 = sshll.u32 %s90_s6, 4  ;;  %p43_p0 = scmp.ne.s32.totalorder %s126_s0, %s42_s10  ;;  %s15_s7 = int_to_ptr.vmem [resolvable:$true] %s14_s7 }
   0x3   :  { %p46_p1 = scmp.lt.u32.totalorder %s42_s10, %s126_s0 }
   0x5   :  { %p48_p2 = pnand %p46_p1, %p43_p0 }
   0x7   :  { %51 = shalt.err (!%p48_p2)
}
   0x8   :  { %s52_s15 = scalar_lea.vmem %s15_s7, 256  ;;  %p57_p4 = scmp.lt.s32.totalorder %s15_s7, %s15_s7 }
   0x9   :  { %p53_p3 = scmp.ne.s32.totalorder %s15_s7, %s52_s15  ;;  %p58_p5 = scmp.lt.s32.totalorder %s52_s15, %s52_s15 }
   0xb   :  { %p59_p6 = por %p58_p5, %p57_p4 }
   0xd   :  { %p60_p7 = pnand %p59_p6, %p53_p3 }
   0xf   :  { %63 = shalt.err (!%p60_p7)
}
  0x10   :  { %17 = dma.hbm_to_vmem [thread:$0]  %s126_s0, 256, %s15_s7, [#allocation3]  }
  0x11   :  { %86 = dma.done.wait [#allocation3], 256  }
  0x12   :  { %87 = vsyncadd [#allocation3], 4294967040  ;;  %s91_s18 = smov [#allocation5]   ;;  %v21_v0 = vld [vmem:[#allocation2] sm:$0xff]  ;;  %v22_v1 = vld [vmem:[#allocation2 + $0x8] sm:$0xff] }
  0x13   :  { %s31_s19 = sshll.u32 %s91_s18, 4  ;;  %23 = vst [vmem:[#allocation5] sm:$0xff] %v21_v0  ;;  %24 = vst [vmem:[#allocation5 + $0x8] sm:$0xff] %v22_v1  ;;  %s32_s19 = int_to_ptr.vmem [resolvable:$true] %s31_s19 }
  0x14   :  { %s64_s20 = scalar_lea.vmem %s32_s19, 256  ;;  %p69_p9 = scmp.lt.s32.totalorder %s32_s19, %s32_s19 }
  0x15   :  { %p65_p8 = scmp.ne.s32.totalorder %s32_s19, %s64_s20  ;;  %p70_p10 = scmp.lt.s32.totalorder %s64_s20, %s64_s20 }
  0x17   :  { %p71_p11 = por %p70_p10, %p69_p9 }
  0x19   :  { %p72_p12 = pnand %p71_p11, %p65_p8 }
  0x1b   :  { %75 = shalt.err (!%p72_p12)
}
  0x1c   :  { %s76_s0 = scalar_lea.hbm %s127_s1, 256 }
  0x1d   :  { %p77_p13 = scmp.ne.s32.totalorder %s127_s1, %s76_s0  ;;  %p80_p0 = scmp.lt.u32.totalorder %s76_s0, %s127_s1 }
  0x1f   :  { %p82_p1 = pnand %p80_p0, %p77_p13 }
  0x21   :  { %85 = shalt.err (!%p82_p1)
}
  0x22   :  { %34 = dma.vmem_to_hbm [thread:$0]  %s32_s19, 256, %s127_s1, [#allocation4]  }
  0x23   :  { %88 = dma.done.wait [#allocation4], 256  }
  0x24   :  { %89 = vsyncadd [#allocation4], 4294967040 }
  0x25   :  { %38 = vsyncpa [#allocation3], 1 }
  0x26   :  { %39 = vsyncpa [#allocation4], 1 }

</bundles_post_ra>
